<compile_context>
chip_gen: v7x
topology: tpu7x:2x2x1
jax: 0.10.0
libtpu: 0.0.40
codegen_flags: <defaults>
</compile_context>

<pallas_src>
import functools

import jax
import jax.numpy as jnp
from jax.experimental import pallas as pl
from jax.experimental.pallas import tpu as pltpu


# ----------------------------------------------------------------------------
# Batch blocking heuristic.
# ----------------------------------------------------------------------------
def _choose_batch_block(B, C, HW, itemsize, vmem_budget_bytes=16 << 20):
    """How many batch items to process per grid step.

    Goals: (a) BB*C >= 8 so each step fills at least one 8-row sublane group and
    per-step overhead is amortized, (b) keep >= 2 grid steps when B allows so
    v7x's two TensorCores both get work, (c) stay inside a conservative VMEM
    budget (double-buffered input + 5x tokens output per batch item).
    """
    per_item = 2 * (C + 5 * C) * HW * itemsize          # in + out, double buffered
    bb_cap = max(1, vmem_budget_bytes // max(per_item, 1))
    divisors = [d for d in range(1, B + 1) if B % d == 0 and d <= bb_cap]
    if not divisors:
        divisors = [1]
    bb_min = max(1, -(-8 // C))                          # ceil(8 / C)
    good = [d for d in divisors if d >= bb_min and B // d >= 2]
    if good:
        return max(good)                                 # fat steps AND >=2 steps
    return max(divisors)                                 # otherwise: fewest steps


# ----------------------------------------------------------------------------
# Fused kernel: ShiftedPatchTokenization + surrogate classifier head.
#   tokens[:, 0] = x
#   tokens[:, 1] = roll(x, (+s, +s))   ... torch.roll semantics, etc.
#   logits       = GAP(tokens) @ W + b   (weights pre-folded via roll-invariance)
#
# torch.roll((sh, sw), dims=(H, W)) on an image flattened to (..., H*W):
#   * roll along H by sh  == global lane rotation by (sh % H) * W
#   * roll along W by sw  == select(lane%W < sw%W) between two global rotations
# The H-rotation amount is a multiple of W, so it commutes with the lane%W mask;
# we therefore build the two W-rolled intermediates once and rotate them.
# ----------------------------------------------------------------------------
def fused_spt_head_kernel(x_ref, w_ref, b_ref, tok_ref, logit_ref, *, shift, H, W):
    x = x_ref[...]                                      # (BB, C, H*W)  lane-dense
    HW = H * W

    def rot(v, amt):
        amt = amt % HW
        return pltpu.roll(v, shift=amt, axis=2) if amt else v

    s = shift % W                                       # W-direction shift
    hs = (shift % H) * W                                # flat rotation for +shift on H
    hm = ((-shift) % H) * W                             # flat rotation for -shift on H

    if s == 0:
        x_wp = x
        x_wm = x
    else:
        # Hoisted masks: one iota + mod + two compares per grid step.
        lane_w = jax.lax.broadcasted_iota(jnp.int32, x.shape, 2) % W
        mask_p = lane_w < s
        mask_m = lane_w < (W - s)
        # roll along W by +shift / -shift (2 XLU rolls + 1 VPU select each).
        x_wp = jnp.where(mask_p, rot(x, s - W), rot(x, s))
        x_wm = jnp.where(mask_m, rot(x, -s), rot(x, W - s))

    # Direct per-view stores into aligned sub-slabs (no concatenate / packing).
    tok_ref[:, 0, :, :] = x
    tok_ref[:, 1, :, :] = rot(x_wp, hs)                 # (+s, +s)
    tok_ref[:, 2, :, :] = rot(x_wp, hm)                 # (-s, +s)
    tok_ref[:, 3, :, :] = rot(x_wm, hs)                 # (+s, -s)
    tok_ref[:, 4, :, :] = rot(x_wm, hm)                 # (-s, -s)

    # Surrogate head: GAP is roll-invariant -> pool only x; the 5 classifier
    # weight groups were pre-summed in the wrapper.  Tiny linear on the VPU
    # (broadcast-mul + sublane reduce), f32 accumulation.
    pooled = jnp.mean(x.astype(jnp.float32), axis=2, keepdims=True)        # (BB, C, 1)
    logits = jnp.sum(pooled * w_ref[...][None, :, :], axis=1, keepdims=True)
    logits = logits + b_ref[...][None, :, :]                               # (BB, 1, NC)
    logit_ref[...] = logits.astype(logit_ref.dtype)


# ----------------------------------------------------------------------------
# Full forward pass: BaseModel(x) = head(SPT(x)); returns (tokens, logits).
# ----------------------------------------------------------------------------
def base_model_forward(x, w_cls, b_cls, patch_size=4, shift_ratio=0.5):
    B, C, H, W = x.shape
    HW = H * W
    num_classes = w_cls.shape[1]
    shift = int(patch_size * shift_ratio)

    # Fold the 5 channel-groups of the classifier weights (roll-invariance of GAP).
    # Only valid for the GAP+linear surrogate head, NOT a real timm backbone.
    w_eff = w_cls.reshape(5, C, num_classes).astype(jnp.float32).sum(axis=0)
    b_eff = b_cls.astype(jnp.float32)

    BB = _choose_batch_block(B, C, HW, jnp.dtype(x.dtype).itemsize)
    grid = (B // BB,)

    x3d = x.reshape(B, C, HW)                           # contiguous (free) reshape

    kernel = functools.partial(fused_spt_head_kernel, shift=shift, H=H, W=W)
    tok4d, logits3d = pl.pallas_call(
        kernel,
        grid=grid,
        out_shape=(
            jax.ShapeDtypeStruct((B, 5, C, HW), x.dtype),
            jax.ShapeDtypeStruct((B, 1, num_classes), jnp.float32),
        ),
        in_specs=[
            pl.BlockSpec((BB, C, HW), lambda i: (i, 0, 0)),
            pl.BlockSpec((C, num_classes), lambda i: (0, 0)),
            pl.BlockSpec((1, num_classes), lambda i: (0, 0)),
        ],
        out_specs=(
            pl.BlockSpec((BB, 5, C, HW), lambda i: (i, 0, 0, 0)),
            pl.BlockSpec((BB, 1, num_classes), lambda i: (i, 0, 0)),
        ),
        compiler_params=pltpu.CompilerParams(dimension_semantics=("parallel",)),
    )(x3d, w_eff, b_eff)

    tokens = tok4d.reshape(B, 5 * C, H, W)              # contiguous (free) reshape
    logits = logits3d.reshape(B, num_classes)
    return tokens, logits


if __name__ == "__main__":
    # Small deterministic config: batch=2, in_chans=4, H=W=16, patch_size=4,
    # num_classes=10. SPT expands channels 4 -> 20.
    B, C, H, W = 2, 4, 16, 16
    patch_size = 4
    num_classes = 10

    key = jax.random.PRNGKey(0)
    kx, kw = jax.random.split(key, 2)
    x = jax.random.normal(kx, (B, C, H, W), dtype=jnp.float32)
    w_cls = jax.random.normal(kw, (5 * C, num_classes), dtype=jnp.float32) * 0.02
    b_cls = jnp.zeros((1, num_classes), dtype=jnp.float32)

    fwd = jax.jit(functools.partial(base_model_forward, patch_size=patch_size))
    tokens, logits = fwd(x, w_cls, b_cls)
    jax.block_until_ready((tokens, logits))

    # Correctness check against a pure-JAX reference.
    s = int(patch_size * 0.5)
    ref_tokens = jnp.concatenate(
        [
            x,
            jnp.roll(x, shift=(s, s), axis=(2, 3)),
            jnp.roll(x, shift=(-s, s), axis=(2, 3)),
            jnp.roll(x, shift=(s, -s), axis=(2, 3)),
            jnp.roll(x, shift=(-s, -s), axis=(2, 3)),
        ],
        axis=1,
    )
    assert tokens.shape == (B, 5 * C, H, W)
    assert logits.shape == (B, num_classes)
    assert jnp.allclose(tokens, ref_tokens), "SPT kernel mismatch vs reference"

    ref_logits = jnp.mean(ref_tokens, axis=(2, 3)) @ w_cls + b_cls
    assert jnp.allclose(logits, ref_logits, atol=1e-5, rtol=1e-5), "head mismatch"

    print("KERNEL_OK")
</pallas_src>

<mosaic_0001>
module attributes {stable_mosaic.version = 11 : i64} {
  func.func @fused_spt_head_kernel(%arg0: i32, %arg1: memref<2x4x256xf32, #tpu.memory_space<vmem>>, %arg2: memref<4x10xf32, #tpu.memory_space<vmem>>, %arg3: memref<1x10xf32, #tpu.memory_space<vmem>>, %arg4: memref<2x5x4x256xf32, #tpu.memory_space<vmem>>, %arg5: memref<2x1x10xf32, #tpu.memory_space<vmem>>) attributes {dimension_semantics = [#tpu.dimension_semantics<parallel>], iteration_bounds = array<i64: 1>, scalar_prefetch = 0 : i64, scratch_operands = 0 : i64, tpu.core_type = #tpu.core_type<tc>, window_params = [{transform_indices = @transform_0, window_bounds = array<i64: 2, 4, 256>}, {pipeline_mode = #tpu.pipeline_mode<synchronous>, transform_indices = @transform_1, window_bounds = array<i64: 4, 10>}, {pipeline_mode = #tpu.pipeline_mode<synchronous>, transform_indices = @transform_2, window_bounds = array<i64: 1, 10>}, {transform_indices = @transform_3, window_bounds = array<i64: 2, 5, 4, 256>}, {transform_indices = @transform_4, window_bounds = array<i64: 2, 1, 10>}]} {
    %c0 = arith.constant 0 : index
    %c0_0 = arith.constant 0 : index
    %c0_1 = arith.constant 0 : index
    %0 = vector.load %arg1[%c0, %c0_0, %c0_1] : memref<2x4x256xf32, #tpu.memory_space<vmem>>, vector<2x4x256xf32>
    %1 = tpu.iota {dimensions = array<i32: 2>} : vector<2x4x256xi32>
    %c16_i32 = arith.constant 16 : i32
    %c0_i32 = arith.constant 0 : i32
    %2 = arith.cmpi eq, %c16_i32, %c0_i32 : i32
    %c1_i32 = arith.constant 1 : i32
    %3 = arith.select %2, %c1_i32, %c16_i32 : i32
    %4 = vector.broadcast %3 : i32 to vector<2x4x256xi32>
    %5 = arith.remsi %1, %4 : vector<2x4x256xi32>
    %c0_i32_2 = arith.constant 0 : i32
    %6 = vector.broadcast %c0_i32_2 : i32 to vector<2x4x256xi32>
    %7 = arith.cmpi ne, %5, %6 : vector<2x4x256xi32>
    %c0_i32_3 = arith.constant 0 : i32
    %8 = vector.broadcast %c0_i32_3 : i32 to vector<2x4x256xi32>
    %9 = arith.cmpi slt, %5, %8 : vector<2x4x256xi32>
    %c0_i32_4 = arith.constant 0 : i32
    %10 = arith.cmpi slt, %3, %c0_i32_4 : i32
    %11 = vector.broadcast %10 : i1 to vector<2x4x256xi1>
    %12 = vector.broadcast %11 : vector<2x4x256xi1> to vector<2x4x256xi1>
    %13 = arith.xori %9, %12 : vector<2x4x256xi1>
    %14 = arith.andi %13, %7 : vector<2x4x256xi1>
    %15 = vector.broadcast %3 : i32 to vector<2x4x256xi32>
    %16 = arith.addi %5, %15 : vector<2x4x256xi32>
    %17 = arith.select %14, %16, %5 : vector<2x4x256xi1>, vector<2x4x256xi32>
    %c2_i32 = arith.constant 2 : i32
    %18 = vector.broadcast %c2_i32 : i32 to vector<2x4x256xi32>
    %19 = arith.cmpi slt, %17, %18 : vector<2x4x256xi32>
    %c14_i32 = arith.constant 14 : i32
    %20 = vector.broadcast %c14_i32 : i32 to vector<2x4x256xi32>
    %21 = arith.cmpi slt, %17, %20 : vector<2x4x256xi32>
    %c242_i32 = arith.constant 242 : i32
    %22 = tpu.dynamic_rotate %0 by %c242_i32 dim 2 : vector<2x4x256xf32>, i32 -> vector<2x4x256xf32>
    %c2_i32_5 = arith.constant 2 : i32
    %23 = tpu.dynamic_rotate %0 by %c2_i32_5 dim 2 : vector<2x4x256xf32>, i32 -> vector<2x4x256xf32>
    %24 = arith.select %19, %22, %23 : vector<2x4x256xi1>, vector<2x4x256xf32>
    %c254_i32 = arith.constant 254 : i32
    %25 = tpu.dynamic_rotate %0 by %c254_i32 dim 2 : vector<2x4x256xf32>, i32 -> vector<2x4x256xf32>
    %c14_i32_6 = arith.constant 14 : i32
    %26 = tpu.dynamic_rotate %0 by %c14_i32_6 dim 2 : vector<2x4x256xf32>, i32 -> vector<2x4x256xf32>
    %27 = arith.select %21, %25, %26 : vector<2x4x256xi1>, vector<2x4x256xf32>
    %c0_7 = arith.constant 0 : index
    %c0_8 = arith.constant 0 : index
    %c0_9 = arith.constant 0 : index
    %c0_10 = arith.constant 0 : index
    %28 = vector.load %arg4[%c0_7, %c0_8, %c0_9, %c0_10] : memref<2x5x4x256xf32, #tpu.memory_space<vmem>>, vector<2x1x4x256xf32>
    %29 = vector.shape_cast %28 : vector<2x1x4x256xf32> to vector<2x4x256xf32>
    %30 = vector.shape_cast %0 : vector<2x4x256xf32> to vector<2x1x4x256xf32>
    tpu.vector_store %arg4[%c0_7, %c0_8, %c0_9, %c0_10], %30 {strides = array<i32>} : memref<2x5x4x256xf32, #tpu.memory_space<vmem>>, vector<2x1x4x256xf32>,
    %c32_i32 = arith.constant 32 : i32
    %31 = tpu.dynamic_rotate %24 by %c32_i32 dim 2 : vector<2x4x256xf32>, i32 -> vector<2x4x256xf32>
    %c0_11 = arith.constant 0 : index
    %c1 = arith.constant 1 : index
    %c0_12 = arith.constant 0 : index
    %c0_13 = arith.constant 0 : index
    %32 = vector.load %arg4[%c0_11, %c1, %c0_12, %c0_13] : memref<2x5x4x256xf32, #tpu.memory_space<vmem>>, vector<2x1x4x256xf32>
    %33 = vector.shape_cast %32 : vector<2x1x4x256xf32> to vector<2x4x256xf32>
    %34 = vector.shape_cast %31 : vector<2x4x256xf32> to vector<2x1x4x256xf32>
    tpu.vector_store %arg4[%c0_11, %c1, %c0_12, %c0_13], %34 {strides = array<i32>} : memref<2x5x4x256xf32, #tpu.memory_space<vmem>>, vector<2x1x4x256xf32>,
    %c224_i32 = arith.constant 224 : i32
    %35 = tpu.dynamic_rotate %24 by %c224_i32 dim 2 : vector<2x4x256xf32>, i32 -> vector<2x4x256xf32>
    %c0_14 = arith.constant 0 : index
    %c2 = arith.constant 2 : index
    %c0_15 = arith.constant 0 : index
    %c0_16 = arith.constant 0 : index
    %36 = vector.load %arg4[%c0_14, %c2, %c0_15, %c0_16] : memref<2x5x4x256xf32, #tpu.memory_space<vmem>>, vector<2x1x4x256xf32>
    %37 = vector.shape_cast %36 : vector<2x1x4x256xf32> to vector<2x4x256xf32>
    %38 = vector.shape_cast %35 : vector<2x4x256xf32> to vector<2x1x4x256xf32>
    tpu.vector_store %arg4[%c0_14, %c2, %c0_15, %c0_16], %38 {strides = array<i32>} : memref<2x5x4x256xf32, #tpu.memory_space<vmem>>, vector<2x1x4x256xf32>,
    %c32_i32_17 = arith.constant 32 : i32
    %39 = tpu.dynamic_rotate %27 by %c32_i32_17 dim 2 : vector<2x4x256xf32>, i32 -> vector<2x4x256xf32>
    %c0_18 = arith.constant 0 : index
    %c3 = arith.constant 3 : index
    %c0_19 = arith.constant 0 : index
    %c0_20 = arith.constant 0 : index
    %40 = vector.load %arg4[%c0_18, %c3, %c0_19, %c0_20] : memref<2x5x4x256xf32, #tpu.memory_space<vmem>>, vector<2x1x4x256xf32>
    %41 = vector.shape_cast %40 : vector<2x1x4x256xf32> to vector<2x4x256xf32>
    %42 = vector.shape_cast %39 : vector<2x4x256xf32> to vector<2x1x4x256xf32>
    tpu.vector_store %arg4[%c0_18, %c3, %c0_19, %c0_20], %42 {strides = array<i32>} : memref<2x5x4x256xf32, #tpu.memory_space<vmem>>, vector<2x1x4x256xf32>,
    %c224_i32_21 = arith.constant 224 : i32
    %43 = tpu.dynamic_rotate %27 by %c224_i32_21 dim 2 : vector<2x4x256xf32>, i32 -> vector<2x4x256xf32>
    %c0_22 = arith.constant 0 : index
    %c4 = arith.constant 4 : index
    %c0_23 = arith.constant 0 : index
    %c0_24 = arith.constant 0 : index
    %44 = vector.load %arg4[%c0_22, %c4, %c0_23, %c0_24] : memref<2x5x4x256xf32, #tpu.memory_space<vmem>>, vector<2x1x4x256xf32>
    %45 = vector.shape_cast %44 : vector<2x1x4x256xf32> to vector<2x4x256xf32>
    %46 = vector.shape_cast %43 : vector<2x4x256xf32> to vector<2x1x4x256xf32>
    tpu.vector_store %arg4[%c0_22, %c4, %c0_23, %c0_24], %46 {strides = array<i32>} : memref<2x5x4x256xf32, #tpu.memory_space<vmem>>, vector<2x1x4x256xf32>,
    %cst = arith.constant dense<0.000000e+00> : vector<2x4xf32>
    %47 = vector.multi_reduction <add>, %0, %cst [2] : vector<2x4x256xf32> to vector<2x4xf32>
    %48 = vector.shape_cast %47 : vector<2x4xf32> to vector<2x4x1xf32>
    %cst_25 = arith.constant 2.560000e+02 : f32
    %49 = vector.broadcast %cst_25 : f32 to vector<2x4x1xf32>
    %50 = arith.divf %48, %49 : vector<2x4x1xf32>
    %c0_26 = arith.constant 0 : index
    %c0_27 = arith.constant 0 : index
    %51 = vector.load %arg2[%c0_26, %c0_27] : memref<4x10xf32, #tpu.memory_space<vmem>>, vector<4x10xf32>
    %52 = vector.shape_cast %51 : vector<4x10xf32> to vector<1x4x10xf32>
    %53 = vector.broadcast %50 : vector<2x4x1xf32> to vector<2x4x10xf32>
    %54 = vector.broadcast %52 : vector<1x4x10xf32> to vector<2x4x10xf32>
    %55 = arith.mulf %53, %54 : vector<2x4x10xf32>
    %cst_28 = arith.constant dense<0.000000e+00> : vector<2x10xf32>
    %56 = vector.multi_reduction <add>, %55, %cst_28 [1] : vector<2x4x10xf32> to vector<2x10xf32>
    %57 = vector.shape_cast %56 : vector<2x10xf32> to vector<2x1x10xf32>
    %c0_29 = arith.constant 0 : index
    %c0_30 = arith.constant 0 : index
    %58 = vector.load %arg3[%c0_29, %c0_30] : memref<1x10xf32, #tpu.memory_space<vmem>>, vector<1x10xf32>
    %59 = vector.shape_cast %58 : vector<1x10xf32> to vector<1x1x10xf32>
    %60 = vector.broadcast %59 : vector<1x1x10xf32> to vector<2x1x10xf32>
    %61 = arith.addf %57, %60 : vector<2x1x10xf32>
    %c0_31 = arith.constant 0 : index
    %c0_32 = arith.constant 0 : index
    %c0_33 = arith.constant 0 : index
    %62 = vector.load %arg5[%c0_31, %c0_32, %c0_33] : memref<2x1x10xf32, #tpu.memory_space<vmem>>, vector<2x1x10xf32>
    tpu.vector_store %arg5[%c0_31, %c0_32, %c0_33], %61 {strides = array<i32>} : memref<2x1x10xf32, #tpu.memory_space<vmem>>, vector<2x1x10xf32>,
    return
  }
  func.func @transform_0(%arg0: i32) -> (i32, i32, i32) {
    %c0_i32 = arith.constant 0 : i32
    %c0_i32_0 = arith.constant 0 : i32
    %c0_i32_1 = arith.constant 0 : i32
    return %arg0, %c0_i32, %c0_i32_0 : i32, i32, i32
  }
  func.func @transform_1(%arg0: i32) -> (i32, i32) {
    %c0_i32 = arith.constant 0 : i32
    %c0_i32_0 = arith.constant 0 : i32
    %c0_i32_1 = arith.constant 0 : i32
    return %c0_i32, %c0_i32_0 : i32, i32
  }
  func.func @transform_2(%arg0: i32) -> (i32, i32) {
    %c0_i32 = arith.constant 0 : i32
    %c0_i32_0 = arith.constant 0 : i32
    %c0_i32_1 = arith.constant 0 : i32
    return %c0_i32, %c0_i32_0 : i32, i32
  }
  func.func @transform_3(%arg0: i32) -> (i32, i32, i32, i32) {
    %c0_i32 = arith.constant 0 : i32
    %c0_i32_0 = arith.constant 0 : i32
    %c0_i32_1 = arith.constant 0 : i32
    %c0_i32_2 = arith.constant 0 : i32
    return %arg0, %c0_i32, %c0_i32_0, %c0_i32_1 : i32, i32, i32, i32
  }
  func.func @transform_4(%arg0: i32) -> (i32, i32, i32) {
    %c0_i32 = arith.constant 0 : i32
    %c0_i32_0 = arith.constant 0 : i32
    %c0_i32_1 = arith.constant 0 : i32
    return %arg0, %c0_i32, %c0_i32_0 : i32, i32, i32
  }
}

</mosaic_0001>

<bundles_post_ra>
// kernel: base_model_forward.1
= control target key start
LH: loop header
LB: loop body
LE: loop exit
PB: predicated region body
PF: predicated region fallthrough
CT: control target
= control target key end

     0   :  { %s313_s19 = smov 114   ;;  %s491_s0 = inlined_call_operand.vmem [shape: f32[2,4,256], index: 0, kind: input, shape index: {}]   ;;  %s492_s1 = inlined_call_operand.vmem [shape: f32[4,10], index: 1, kind: input, shape index: {}]   ;;  %s493_s2 = inlined_call_operand.vmem [shape: f32[1,10], index: 2, kind: input, shape index: {}]   ;;  %s494_s3 = inlined_call_operand.vmem [shape: f32[2,5,4,256], index: 3, kind: output, shape index: {0}]   ;;  %s495_s4 = inlined_call_operand.hbm [shape: f32[2,1,10], index: 4, kind: output, shape index: {1}]  }
   0x1   :  { %v17_v0 = vld [vmem:[%s491_s0] sm:$0xff]  ;;  %v18_v1 = vld [vmem:[%s491_s0 + $0x8] sm:$0xff] }
   0x2   :  { %56 = vrot.lane.b32.xlu0 %v17_v0, %s313_s19  ;;  %116 = vst [vmem:[%s494_s3] sm:$0xff] %v17_v0  ;;  %v52_v2 = vcombine.high %v17_v0, %v17_v0  ;;  %117 = vst [vmem:[%s494_s3 + $0x28] sm:$0xff] %v18_v1 }
   0x3   :  { %10 = vsyncpa [#allocation3], 0  ;;  %v53_v3 = vcombine.high %v18_v1, %v18_v1  ;;  %s314_s24 = smov 2   ;;  %s315_s0 = smov 126   ;;  %vm212_vm0 = vcmask 1043456   ;;  %v19_v11 = vlaneseq  ;;  %vm229_vm9 = vcmask 76800  }
   0x4   :  { %60 = vrot.lane.b32.xlu1 %v52_v2, %s313_s19  ;;  %s316_s25 = smov 14   ;;  %v213_v4 = vsel %vm212_vm0, %v17_v0, 0.0  ;;  %v214_v5 = vsel %vm212_vm0, %v52_v2, 0.0  ;;  %v218_v7 = vsel %vm212_vm0, %v18_v1, 0.0  ;;  %s317_s26 = smov 32   ;;  %vm247_vm10 = vcmask 73728  }
   0x5   :  { %v215_v6 = vadd.f32 %v214_v5, %v213_v4  ;;  %v219_v8 = vsel %vm212_vm0, %v53_v3, 0.0  ;;  %v359_v14 = vand.u32 127, %v19_v11  ;;  %s318_s27 = smov 96   ;;  %v226_v55 = vld [vmem:[%s492_s1] sm:$0xf]  ;;  %s319_s1 = smov [#allocation2]  }
   0x6   :  { %58 = vrot.lane.b32.xlu0 %v18_v1, %s313_s19  ;;  %v220_v9 = vadd.f32 %v219_v8, %v218_v7  ;;  %v244_v7 = vld [vmem:[%s493_s2] sm:$0x1]  ;;  %s257_s6 = sshll.u32 %s319_s1, 4  ;;  %s258_s6 = int_to_ptr.vmem [resolvable:$true] %s257_s6 }
   0x7   :  { %v26_v16 = vand.u32 15, %v359_v14  ;;  %v21_v17 = vadd.s32 128, %v359_v14  ;;  %vm64_vm1 = vcmp.lt.s32.totalorder %v359_v14, 114  ;;  %vm77_vm2 = vcmp.lt.s32.totalorder %v359_v14, 2  ;;  %s289_s7 = scalar_lea.vmem %s258_s6, 32  ;;  %p294_p1 = scmp.lt.s32.totalorder %s258_s6, %s258_s6 }
   0x8   :  { %62 = vrot.lane.b32.xlu1 %v53_v3, %s313_s19  ;;  %vm94_vm5 = vcmp.lt.s32.totalorder %v359_v14, 126  ;;  %vm107_vm6 = vcmp.lt.s32.totalorder %v359_v14, 14  ;;  %p290_p0 = scmp.ne.s32.totalorder %s258_s6, %s289_s7  ;;  %p295_p2 = scmp.lt.s32.totalorder %s289_s7, %s289_s7 }
   0x9   :  { %vm46_vm3 = vcmp.lt.s32.totalorder %v26_v16, 2  ;;  %v33_v20 = vand.u32 15, %v21_v17  ;;  %vm48_vm7 = vcmp.lt.s32.totalorder %v26_v16, 14 }
   0xa   :  { %69 = vrot.lane.b32.xlu0 %v17_v0, %s314_s24  ;;  %p296_p3 = por %p295_p2, %p294_p1 }
   0xb   :  { %vm47_vm4 = vcmp.lt.s32.totalorder %v33_v20, 2  ;;  %vm49_vm8 = vcmp.lt.s32.totalorder %v33_v20, 14 }
   0xc   :  { %71 = vrot.lane.b32.xlu1 %v18_v1, %s314_s24  ;;  %p297_p4 = pnand %p296_p3, %p290_p0 }
   0xe   :  { %73 = vrot.lane.b32.xlu0 %v52_v2, %s314_s24 }
  0x10   :  { %75 = vrot.lane.b32.xlu1 %v53_v3, %s314_s24 }
  0x12   :  { %86 = vrot.lane.b32.xlu0 %v17_v0, %s315_s0 }
  0x14   :  { %88 = vrot.lane.b32.xlu1 %v18_v1, %s315_s0 }
  0x16   :  { %90 = vrot.lane.b32.xlu0 %v52_v2, %s315_s0 }
  0x18   :  { %92 = vrot.lane.b32.xlu1 %v53_v3, %s315_s0 }
  0x1a   :  { %99 = vrot.lane.b32.xlu0 %v17_v0, %s316_s25 }
  0x1c   :  { %101 = vrot.lane.b32.xlu1 %v18_v1, %s316_s25 }
  0x1e   :  { %103 = vrot.lane.b32.xlu0 %v52_v2, %s316_s25 }
  0x20   :  { %105 = vrot.lane.b32.xlu1 %v53_v3, %s316_s25 }
  0x3d   :  { %216 = vadd.xlane.f32.xlu0 %v215_v6 }
  0x44   :  { %221 = vadd.xlane.f32.xlu1 %v220_v9 }
  0x74   :  { %v57_v10 = vpop.permute.xlu0 %56 }
  0x76   :  { %v61_v12 = vpop.permute.xlu1 %60 }
  0x77   :  { %v65_v22 = vsel %vm64_vm1, %v57_v10, %v61_v12  ;;  %v67_v31 = vsel %vm64_vm1, %v61_v12, %v57_v10 }
  0x78   :  { %v59_v13 = vpop.permute.xlu0 %58 }
  0x7a   :  { %v63_v15 = vpop.permute.xlu1 %62 }
  0x7b   :  { %v66_v26 = vsel %vm64_vm1, %v59_v13, %v63_v15  ;;  %v68_v35 = vsel %vm64_vm1, %v63_v15, %v59_v13 }
  0x7c   :  { %v70_v18 = vpop.permute.xlu0 %69 }
  0x7e   :  { %v72_v19 = vpop.permute.xlu1 %71 }
  0x80   :  { %v74_v21 = vpop.permute.xlu0 %73 }
  0x81   :  { %v80_v23 = vsel %vm77_vm2, %v74_v21, %v70_v18  ;;  %v78_v27 = vsel %vm77_vm2, %v70_v18, %v74_v21 }
  0x82   :  { %v76_v24 = vpop.permute.xlu1 %75  ;;  %v82_v25 = vsel %vm46_vm3, %v65_v22, %v80_v23  ;;  %v83_v34 = vsel %vm47_vm4, %v67_v31, %v78_v27 }
  0x83   :  { %v81_v28 = vsel %vm77_vm2, %v76_v24, %v72_v19  ;;  %118 = vrot.lane.b32.xlu0 %v82_v25, %s317_s26  ;;  %v79_v32 = vsel %vm77_vm2, %v72_v19, %v76_v24 }
  0x84   :  { %v87_v29 = vpop.permute.xlu0 %86  ;;  %v84_v30 = vsel %vm46_vm3, %v66_v26, %v81_v28  ;;  %v85_v37 = vsel %vm47_vm4, %v68_v35, %v79_v32 }
  0x85   :  { %120 = vrot.lane.b32.xlu1 %v84_v30, %s317_s26 }
  0x86   :  { %v89_v33 = vpop.permute.xlu1 %88 }
  0x87   :  { %122 = vrot.lane.b32.xlu0 %v83_v34, %s317_s26 }
  0x88   :  { %v91_v36 = vpop.permute.xlu0 %90 }
  0x89   :  { %124 = vrot.lane.b32.xlu1 %v85_v37, %s317_s26  ;;  %v95_v42 = vsel %vm94_vm5, %v87_v29, %v91_v36  ;;  %v97_v50 = vsel %vm94_vm5, %v91_v36, %v87_v29 }
  0x8a   :  { %v93_v38 = vpop.permute.xlu1 %92 }
  0x8b   :  { %142 = vrot.lane.b32.xlu0 %v82_v25, %s318_s27  ;;  %v96_v46 = vsel %vm94_vm5, %v89_v33, %v93_v38  ;;  %v98_v53 = vsel %vm94_vm5, %v93_v38, %v89_v33 }
  0x8c   :  { %v100_v39 = vpop.permute.xlu0 %99 }
  0x8d   :  { %144 = vrot.lane.b32.xlu1 %v84_v30, %s318_s27 }
  0x8e   :  { %v102_v40 = vpop.permute.xlu1 %101 }
  0x8f   :  { %146 = vrot.lane.b32.xlu0 %v83_v34, %s318_s27 }
  0x90   :  { %v104_v41 = vpop.permute.xlu0 %103 }
  0x91   :  { %v110_v43 = vsel %vm107_vm6, %v104_v41, %v100_v39  ;;  %148 = vrot.lane.b32.xlu1 %v85_v37, %s318_s27  ;;  %v108_v47 = vsel %vm107_vm6, %v100_v39, %v104_v41 }
  0x92   :  { %v106_v44 = vpop.permute.xlu1 %105  ;;  %v112_v45 = vsel %vm48_vm7, %v95_v42, %v110_v43  ;;  %v113_v52 = vsel %vm49_vm8, %v97_v50, %v108_v47 }
  0x93   :  { %v111_v48 = vsel %vm107_vm6, %v106_v44, %v102_v40  ;;  %166 = vrot.lane.b32.xlu0 %v112_v45, %s317_s26  ;;  %v109_v51 = vsel %vm107_vm6, %v102_v40, %v106_v44 }
  0x94   :  { %v114_v49 = vsel %vm48_vm7, %v96_v46, %v111_v48  ;;  %v115_v54 = vsel %vm49_vm8, %v98_v53, %v109_v51 }
  0x95   :  { %168 = vrot.lane.b32.xlu1 %v114_v49, %s317_s26 }
  0x97   :  { %170 = vrot.lane.b32.xlu0 %v113_v52, %s317_s26 }
  0x99   :  { %172 = vrot.lane.b32.xlu1 %v115_v54, %s317_s26 }
  0x9b   :  { %189 = vrot.lane.b32.xlu0 %v112_v45, %s318_s27 }
  0x9d   :  { %191 = vrot.lane.b32.xlu1 %v114_v49, %s318_s27 }
  0x9f   :  { %193 = vrot.lane.b32.xlu0 %v113_v52, %s318_s27 }
  0xa1   :  { %195 = vrot.lane.b32.xlu1 %v115_v54, %s318_s27 }
  0xca   :  { %v217_v56 = vpop.xlane.xlu0 %216 }
  0xcb   :  { %v224_v57 = vmul.f32 0.00390625, %v217_v56 }
  0xcd   :  { %v227_v58 = vmul.f32 %v226_v55, %v224_v57 }
  0xcf   :  { %v230_v59 = vsel %vm229_vm9, %v227_v58, 0.0 }
  0xd0   :  { %v231_v60 = vrot.slane %v230_v59, 4 }
  0xd1   :  { %v222_v61 = vpop.xlane.xlu1 %221 }
  0xd2   :  { %v225_v62 = vmul.f32 0.00390625, %v222_v61  ;;  %v232_v63 = vadd.f32 %v231_v60, %v230_v59 }
  0xd4   :  { %v228_v0 = vmul.f32 %v226_v55, %v225_v62  ;;  %v233_v1 = vrot.slane %v232_v63, 2 }
  0xd6   :  { %v237_v2 = vsel %vm229_vm9, %v228_v0, 0.0  ;;  %v234_v3 = vadd.f32 %v233_v1, %v232_v63 }
  0xd7   :  { %v238_v4 = vrot.slane %v237_v2, 4 }
  0xd8   :  { %v235_v5 = vrot.slane %v234_v3, 1 }
  0xd9   :  { %v239_v6 = vadd.f32 %v238_v4, %v237_v2 }
  0xda   :  { %v236_v8 = vadd.f32 %v235_v5, %v234_v3 }
  0xdb   :  { %v240_v9 = vrot.slane %v239_v6, 2 }
  0xdc   :  { %v245_v10 = vadd.f32 %v244_v7, %v236_v8 }
  0xdd   :  { %v241_v11 = vadd.f32 %v240_v9, %v239_v6 }
  0xde   :  { %248 = vst.msk [vmem:[#allocation2] sm:$0x1] %vm247_vm10, %v245_v10 }
  0xdf   :  { %v242_v12 = vrot.slane %v241_v11, 1 }
  0xe1   :  { %v243_v13 = vadd.f32 %v242_v12, %v241_v11 }
  0xe3   :  { %v246_v15 = vadd.f32 %v244_v7, %v243_v13 }
  0xe5   :  { %249 = vst.msk [vmem:[#allocation2 + $0x1] sm:$0x1] %vm247_vm10, %v246_v15 }
  0xe6   :  { %300 = shalt.err (!%p297_p4)
}
  0xe7   :  { %s301_s9 = scalar_lea.hbm %s495_s4, 32 }
  0xe8   :  { %p302_p5 = scmp.ne.s32.totalorder %s495_s4, %s301_s9  ;;  %p305_p6 = scmp.lt.u32.totalorder %s301_s9, %s495_s4 }
  0xea   :  { %p307_p7 = pnand %p305_p6, %p302_p5 }
  0xec   :  { %310 = shalt.err (!%p307_p7)
}
  0xed   :  { %s320_s14 = smov 16   ;;  %s321_s15 = smov 1   ;;  %vm126_vm11 = vcmp.lt.s32.totalorder %v359_v14, 32  ;;  %vm150_vm12 = vcmp.lt.s32.totalorder %v359_v14, 96 }
  0xee   :  { %263 = dma.vmem_to_hbm [thread:$0]  %s258_s6, 32, %s495_s4, [#allocation3], %s320_s14, %s320_s14, %s321_s15  }
  0xf5   :  { %v119_v16 = vpop.permute.xlu0 %118 }
  0xf7   :  { %v121_v17 = vpop.permute.xlu1 %120 }
  0xf9   :  { %v123_v18 = vpop.permute.xlu0 %122 }
  0xfa   :  { %v127_v19 = vsel %vm126_vm11, %v119_v16, %v123_v18  ;;  %v129_v20 = vsel %vm126_vm11, %v123_v18, %v119_v16 }
  0xfb   :  { %v135_v21 = vcombine.low %v129_v20, %v127_v19  ;;  %v125_v22 = vpop.permute.xlu1 %124 }
  0xfc   :  { %v128_v23 = vsel %vm126_vm11, %v121_v17, %v125_v22  ;;  %v130_v24 = vsel %vm126_vm11, %v125_v22, %v121_v17 }
  0xfd   :  { %270 = vst [vmem:[%s494_s3 + $0x8] sm:$0xff] %v135_v21  ;;  %v136_v25 = vcombine.low %v130_v24, %v128_v23  ;;  %v143_v26 = vpop.permute.xlu0 %142 }
  0xff   :  { %271 = vst [vmem:[%s494_s3 + $0x30] sm:$0xff] %v136_v25  ;;  %v145_v27 = vpop.permute.xlu1 %144 }
 0x101   :  { %v147_v28 = vpop.permute.xlu0 %146 }
 0x102   :  { %v151_v29 = vsel %vm150_vm12, %v143_v26, %v147_v28  ;;  %v153_v30 = vsel %vm150_vm12, %v147_v28, %v143_v26 }
 0x103   :  { %v159_v31 = vcombine.low %v151_v29, %v153_v30  ;;  %v149_v32 = vpop.permute.xlu1 %148 }
 0x104   :  { %v152_v33 = vsel %vm150_vm12, %v145_v27, %v149_v32  ;;  %v154_v34 = vsel %vm150_vm12, %v149_v32, %v145_v27 }
 0x105   :  { %272 = vst [vmem:[%s494_s3 + $0x10] sm:$0xff] %v159_v31  ;;  %v160_v35 = vcombine.low %v152_v33, %v154_v34  ;;  %v167_v36 = vpop.permute.xlu0 %166 }
 0x107   :  { %273 = vst [vmem:[%s494_s3 + $0x38] sm:$0xff] %v160_v35  ;;  %v169_v37 = vpop.permute.xlu1 %168 }
 0x109   :  { %v171_v38 = vpop.permute.xlu0 %170 }
 0x10a   :  { %v174_v39 = vsel %vm126_vm11, %v167_v36, %v171_v38  ;;  %v176_v40 = vsel %vm126_vm11, %v171_v38, %v167_v36 }
 0x10b   :  { %v182_v41 = vcombine.low %v176_v40, %v174_v39  ;;  %v173_v42 = vpop.permute.xlu1 %172 }
 0x10c   :  { %v175_v43 = vsel %vm126_vm11, %v169_v37, %v173_v42  ;;  %v177_v44 = vsel %vm126_vm11, %v173_v42, %v169_v37 }
 0x10d   :  { %274 = vst [vmem:[%s494_s3 + $0x18] sm:$0xff] %v182_v41  ;;  %v183_v45 = vcombine.low %v177_v44, %v175_v43  ;;  %v190_v46 = vpop.permute.xlu0 %189 }
 0x10f   :  { %275 = vst [vmem:[%s494_s3 + $0x40] sm:$0xff] %v183_v45  ;;  %v192_v47 = vpop.permute.xlu1 %191 }
 0x111   :  { %v194_v48 = vpop.permute.xlu0 %193 }
 0x112   :  { %v197_v49 = vsel %vm150_vm12, %v190_v46, %v194_v48  ;;  %v199_v50 = vsel %vm150_vm12, %v194_v48, %v190_v46 }
 0x113   :  { %v205_v51 = vcombine.low %v197_v49, %v199_v50  ;;  %v196_v52 = vpop.permute.xlu1 %195 }
 0x114   :  { %v198_v53 = vsel %vm150_vm12, %v192_v47, %v196_v52  ;;  %v200_v54 = vsel %vm150_vm12, %v196_v52, %v192_v47 }
 0x115   :  { %276 = vst [vmem:[%s494_s3 + $0x20] sm:$0xff] %v205_v51  ;;  %v206_v55 = vcombine.low %v198_v53, %v200_v54 }
 0x117   :  { %277 = vst [vmem:[%s494_s3 + $0x48] sm:$0xff] %v206_v55 }
 0x118   :  { %311 = dma.done.wait [#allocation3], 32  }
 0x119   :  { %312 = vsyncadd [#allocation3], 4294967264 }
 0x11a   :  { %269 = vsyncpa [#allocation3], 1 }

</bundles_post_ra>
